<compile_context>
chip_gen: v6e
topology: v6e:2x2x1
jax: 0.10.0
libtpu: 0.0.40
codegen_flags: <defaults>
</compile_context>

<pallas_src>
import functools

import jax
import jax.numpy as jnp
from jax import lax
from jax.experimental import pallas as pl
from jax.experimental.pallas import tpu as pltpu


# ------------------------------- helpers ------------------------------------

def _pick_tile(n, target, align):
    """Largest tile <= target that divides n and is a multiple of `align`
    (falls back to the full dimension, which is always a legal block)."""
    if n <= target:
        return n
    for t in range(target - target % align, 0, -align):
        if n % t == 0:
            return t
    return n


# ------------------------- tiled linear (QKV proj) --------------------------

def _matmul_bias_kernel(x_ref, w_ref, b_ref, o_ref, acc_ref):
    @pl.when(pl.program_id(2) == 0)
    def _init():
        acc_ref[...] = jnp.zeros_like(acc_ref)

    acc_ref[...] += jnp.dot(x_ref[...], w_ref[...],
                            preferred_element_type=jnp.float32)

    @pl.when(pl.program_id(2) == pl.num_programs(2) - 1)
    def _done():
        o_ref[...] = (acc_ref[...] + b_ref[...]).astype(o_ref.dtype)


def linear_pallas(x, w, b, out_dtype=None, tm=256, tn=512, tk=512):
    """y = x @ w + b with lane-dense tiled output."""
    M, K = x.shape
    Nout = w.shape[1]
    out_dtype = out_dtype or x.dtype
    tm = _pick_tile(M, tm, 8)
    tn = _pick_tile(Nout, tn, 128)
    tk = _pick_tile(K, tk, 128)
    return pl.pallas_call(
        _matmul_bias_kernel,
        out_shape=jax.ShapeDtypeStruct((M, Nout), out_dtype),
        grid=(M // tm, Nout // tn, K // tk),
        in_specs=[
            pl.BlockSpec((tm, tk), lambda i, j, kk: (i, kk)),
            pl.BlockSpec((tk, tn), lambda i, j, kk: (kk, j)),
            pl.BlockSpec((1, tn), lambda i, j, kk: (0, j)),
        ],
        out_specs=pl.BlockSpec((tm, tn), lambda i, j, kk: (i, j)),
        scratch_shapes=[pltpu.VMEM((tm, tn), jnp.float32)],
        compiler_params=pltpu.CompilerParams(
            dimension_semantics=("parallel", "parallel", "arbitrary")),
    )(x, w, b.reshape(1, Nout))


# ------------- output projection with head-merge folded into K axis ---------

def _proj_merge_kernel(o_ref, w_ref, b_ref, out_ref, acc_ref):
    @pl.when(pl.program_id(2) == 0)
    def _init():
        acc_ref[...] = jnp.zeros_like(acc_ref)

    acc_ref[...] += jnp.dot(o_ref[...], w_ref[...],
                            preferred_element_type=jnp.float32)

    @pl.when(pl.program_id(2) == pl.num_programs(2) - 1)
    def _done():
        out_ref[...] = (acc_ref[...] + b_ref[...]).astype(out_ref.dtype)


def proj_merge_heads_pallas(o, w, b, out_dtype, tm=256, tn=512):
    """out[b, n, :] = sum_h o[b, h, n, :] @ w[h] + b.
    o: (B, nh, N, hd)  w: (nh, hd, dim_out)  -> (B, N, dim_out).
    The head axis is the (arbitrary) reduction grid axis, so the usual
    (B,nh,N,hd)->(B,N,nh*hd) transpose never touches HBM."""
    B, nh, N, hd = o.shape
    dim_out = w.shape[-1]
    tm = _pick_tile(N, tm, 8)
    tn = _pick_tile(dim_out, tn, 128)
    mt = N // tm
    return pl.pallas_call(
        _proj_merge_kernel,
        out_shape=jax.ShapeDtypeStruct((B, N, dim_out), out_dtype),
        grid=(B * mt, dim_out // tn, nh),
        in_specs=[
            pl.BlockSpec((None, None, tm, hd),
                         lambda i, j, h: (i // mt, h, i % mt, 0)),
            pl.BlockSpec((None, hd, tn), lambda i, j, h: (h, 0, j)),
            pl.BlockSpec((1, tn), lambda i, j, h: (0, j)),
        ],
        out_specs=pl.BlockSpec((None, tm, tn),
                               lambda i, j, h: (i // mt, i % mt, j)),
        scratch_shapes=[pltpu.VMEM((tm, tn), jnp.float32)],
        compiler_params=pltpu.CompilerParams(
            dimension_semantics=("parallel", "parallel", "arbitrary")),
    )(o, w, b.reshape(1, dim_out))


# --------------------------- attention core kernel --------------------------

def _attn_kernel(q_ref, k_ref, v_ref, *rest, scale, use_rel_pos, heads_per_block):
    if use_rel_pos:
        rel_ref, exp_ref, o_ref = rest
    else:
        (o_ref,) = rest

    for g in range(heads_per_block):        # static unroll over the head group
        q = q_ref[g]                        # (tq, hd)
        k = k_ref[g]                        # (Nk, hd)
        # q @ k^T without an explicit transpose: contract last dims.
        s = lax.dot_general(q, k, (((1,), (1,)), ((), ())),
                            preferred_element_type=jnp.float32) * scale
        if use_rel_pos:
            # rebuild the decomposed rel-pos bias tile on the fly:
            # (tq, D+H+W) x (D+H+W, Nk) one-hot expansion -> (tq, Nk)
            s = s + jnp.dot(rel_ref[g], exp_ref[...],
                            preferred_element_type=jnp.float32)
        m = jnp.max(s, axis=-1, keepdims=True)
        p = jnp.exp(s - m)
        denom = jnp.sum(p, axis=-1, keepdims=True)
        o = jnp.dot(p.astype(v_ref.dtype), v_ref[g],
                    preferred_element_type=jnp.float32)
        o_ref[g] = (o * pl.reciprocal(denom, approx=True)).astype(o_ref.dtype)


def attention_core_pallas(q, k, v, rel_cat, expand, scale,
                          *, heads_per_block=None, q_tile=256):
    """q,k,v: (B, nh, N, hd); rel_cat: (B, nh, N, D+H+W) or None;
    expand: (D+H+W, N) or None.  Returns (B, nh, N, hd)."""
    B, nh, N, hd = q.shape
    use_rel_pos = rel_cat is not None

    # pack heads so G*hd >= 128 lanes when possible (and G divides nh)
    G = heads_per_block or min(nh, max(1, 128 // max(hd, 1)))
    G = max(1, min(G, nh))
    while nh % G:
        G -= 1
    hb = nh // G

    tq = _pick_tile(N, q_tile, 8)
    nq = N // tq

    def q_map(i, qi):
        return (i // hb, i % hb, qi, 0)

    def kv_map(i, qi):
        return (i // hb, i % hb, 0, 0)

    in_specs = [
        pl.BlockSpec((None, G, tq, hd), q_map),
        pl.BlockSpec((None, G, N, hd), kv_map),
        pl.BlockSpec((None, G, N, hd), kv_map),
    ]
    args = [q, k, v]
    if use_rel_pos:
        Kc = rel_cat.shape[-1]
        in_specs.append(pl.BlockSpec((None, G, tq, Kc), q_map))
        in_specs.append(pl.BlockSpec((Kc, N), lambda i, qi: (0, 0)))
        args += [rel_cat, expand]

    kernel = functools.partial(_attn_kernel, scale=scale,
                               use_rel_pos=use_rel_pos, heads_per_block=G)
    return pl.pallas_call(
        kernel,
        out_shape=jax.ShapeDtypeStruct((B, nh, N, hd), q.dtype),
        grid=(B * hb, nq),
        in_specs=in_specs,
        out_specs=pl.BlockSpec((None, G, tq, hd), q_map),
        compiler_params=pltpu.CompilerParams(
            dimension_semantics=("parallel", "parallel")),
    )(*args)


# -------------------- rel-pos terms (small, plain JAX glue) ------------------

def get_rel_pos(q_size, k_size, rel_pos):
    max_rel_dist = int(2 * max(q_size, k_size) - 1)
    # TODO(synk): linear-interpolation branch (rel_pos.shape[0] != max_rel_dist) not
    # implemented; parameters are created at exactly 2*size-1 as in the module __init__.
    assert rel_pos.shape[0] == max_rel_dist
    q_coords = jnp.arange(q_size)[:, None] * max(k_size / q_size, 1.0)
    k_coords = jnp.arange(k_size)[None, :] * max(q_size / k_size, 1.0)
    relative_coords = q_coords - k_coords + (k_size - 1) * max(q_size / k_size, 1.0)
    return rel_pos[relative_coords.astype(jnp.int32)]


def _rel_terms(q, rel_pos_d, rel_pos_h, rel_pos_w, dhw, dtype):
    """Per-axis rel-pos terms concatenated to (B, nh, N, D+H+W) plus the constant
    one-hot expansion matrix (D+H+W, N).  bias = rel_cat @ expand (built in-kernel)."""
    D, H, W = dhw
    B, nh, N, hd = q.shape
    Rd = get_rel_pos(D, D, rel_pos_d)
    Rh = get_rel_pos(H, H, rel_pos_h)
    Rw = get_rel_pos(W, W, rel_pos_w)
    r_q = q.reshape(B * nh, D, H, W, hd)
    rel_d = jnp.einsum('bdhwc,dkc->bdhwk', r_q, Rd).reshape(B, nh, N, D)
    rel_h = jnp.einsum('bdhwc,hkc->bdhwk', r_q, Rh).reshape(B, nh, N, H)
    rel_w = jnp.einsum('bdhwc,wkc->bdhwk', r_q, Rw).reshape(B, nh, N, W)
    rel_cat = jnp.concatenate([rel_d, rel_h, rel_w], axis=-1).astype(dtype)

    kk = jnp.arange(N)
    e_d = (jnp.arange(D)[:, None] == kk[None, :] // (H * W)).astype(dtype)
    e_h = (jnp.arange(H)[:, None] == (kk[None, :] // W) % H).astype(dtype)
    e_w = (jnp.arange(W)[:, None] == kk[None, :] % W).astype(dtype)
    expand = jnp.concatenate([e_d, e_h, e_w], axis=0)      # (D+H+W, N)
    return rel_cat, expand


# ------------------------------- forward pass --------------------------------

def attention_forward(x, w_qkv, b_qkv, w_proj, b_proj,
                      rel_pos_d=None, rel_pos_h=None, rel_pos_w=None,
                      *, num_heads, use_rel_pos=True,
                      compute_dtype=jnp.float32):
    B, D, H, W, dim = x.shape
    N = D * H * W
    nh = num_heads
    hd = dim // nh
    scale = hd ** -0.5
    out_dtype = x.dtype
    cd = compute_dtype   # set to jnp.bfloat16 on v6e/v7x for MXU rate (f32 accum kept)

    # 1) QKV projection (tiled, lane-dense output)
    x2 = x.reshape(B * N, dim).astype(cd)
    qkv = linear_pallas(x2, w_qkv.astype(cd), b_qkv.astype(cd), out_dtype=cd)

    # 2) head split: (B*N, 3*dim) -> (3, B, nh, N, hd)  (single XLA transpose; see header)
    qkv = jnp.transpose(qkv.reshape(B, N, 3, nh, hd), (2, 0, 3, 1, 4))
    q, k, v = qkv[0], qkv[1], qkv[2]

    # 3) small per-axis rel-pos terms (no N^2 bias in HBM)
    if use_rel_pos:
        rel_cat, expand = _rel_terms(q.astype(jnp.float32),
                                     rel_pos_d, rel_pos_h, rel_pos_w,
                                     (D, H, W), cd)
    else:
        rel_cat, expand = None, None

    # 4) attention (bias rebuilt in-kernel, heads packed per grid step)
    o = attention_core_pallas(q, k, v, rel_cat, expand, scale)   # (B, nh, N, hd)

    # 5) output projection; head merge folded into the reduction grid axis
    out = proj_merge_heads_pallas(o, w_proj.astype(cd).reshape(nh, hd, dim),
                                  b_proj.astype(cd), out_dtype)  # (B, N, dim)
    return out.reshape(B, D, H, W, dim)


# -------------------- pure-JAX reference (mirrors the PyTorch) ---------------

def attention_reference(x, w_qkv, b_qkv, w_proj, b_proj,
                        rel_pos_d, rel_pos_h, rel_pos_w, num_heads,
                        use_rel_pos=True):
    B, D, H, W, dim = x.shape
    N = D * H * W
    nh = num_heads
    hd = dim // nh
    scale = hd ** -0.5
    qkv = x.reshape(B * N, dim) @ w_qkv + b_qkv
    qkv = jnp.transpose(qkv.reshape(B, N, 3, nh, hd), (2, 0, 3, 1, 4))
    qkv = qkv.reshape(3, B * nh, N, hd)
    q, k, v = qkv[0], qkv[1], qkv[2]
    attn = (q * scale) @ jnp.swapaxes(k, -2, -1)
    if use_rel_pos:
        Rd = get_rel_pos(D, D, rel_pos_d)
        Rh = get_rel_pos(H, H, rel_pos_h)
        Rw = get_rel_pos(W, W, rel_pos_w)
        r_q = q.reshape(B * nh, D, H, W, hd)
        rel_d = jnp.einsum('bdhwc,dkc->bdhwk', r_q, Rd)
        rel_h = jnp.einsum('bdhwc,hkc->bdhwk', r_q, Rh)
        rel_w = jnp.einsum('bdhwc,wkc->bdhwk', r_q, Rw)
        bias = (rel_d[..., :, None, None]
                + rel_h[..., None, :, None]
                + rel_w[..., None, None, :]).reshape(B * nh, N, N)
        attn = attn + bias
    attn = jax.nn.softmax(attn, axis=-1)
    o = (attn @ v).reshape(B, nh, D, H, W, hd)
    o = jnp.transpose(o, (0, 2, 3, 4, 1, 5)).reshape(B * N, dim)
    return (o @ w_proj + b_proj).reshape(B, D, H, W, dim)


if __name__ == "__main__":
    B, D, H, W = 2, 4, 4, 4
    dim, num_heads = 32, 4
    hd = dim // num_heads

    key = jax.random.PRNGKey(0)
    ks = jax.random.split(key, 8)
    x = jax.random.normal(ks[0], (B, D, H, W, dim), jnp.float32)
    w_qkv = jax.random.normal(ks[1], (dim, 3 * dim), jnp.float32) * 0.05
    b_qkv = jax.random.normal(ks[2], (3 * dim,), jnp.float32) * 0.05
    w_proj = jax.random.normal(ks[3], (dim, dim), jnp.float32) * 0.05
    b_proj = jax.random.normal(ks[4], (dim,), jnp.float32) * 0.05
    rel_pos_d = jax.random.normal(ks[5], (2 * D - 1, hd), jnp.float32) * 0.05
    rel_pos_h = jax.random.normal(ks[6], (2 * H - 1, hd), jnp.float32) * 0.05
    rel_pos_w = jax.random.normal(ks[7], (2 * W - 1, hd), jnp.float32) * 0.05

    # with decomposed rel-pos bias
    out = attention_forward(x, w_qkv, b_qkv, w_proj, b_proj,
                            rel_pos_d, rel_pos_h, rel_pos_w,
                            num_heads=num_heads, use_rel_pos=True)
    out = jax.block_until_ready(out)
    ref = attention_reference(x, w_qkv, b_qkv, w_proj, b_proj,
                              rel_pos_d, rel_pos_h, rel_pos_w, num_heads,
                              use_rel_pos=True)
    ref = jax.block_until_ready(ref)
    assert out.shape == (B, D, H, W, dim)
    assert jnp.allclose(out, ref, atol=2e-3, rtol=2e-3), (
        f"max err {jnp.max(jnp.abs(out - ref))}")

    # without rel-pos (bias-free kernel variant, no zero N^2 tensor)
    out0 = attention_forward(x, w_qkv, b_qkv, w_proj, b_proj,
                             num_heads=num_heads, use_rel_pos=False)
    out0 = jax.block_until_ready(out0)
    ref0 = attention_reference(x, w_qkv, b_qkv, w_proj, b_proj,
                               rel_pos_d, rel_pos_h, rel_pos_w, num_heads,
                               use_rel_pos=False)
    assert jnp.allclose(out0, ref0, atol=2e-3, rtol=2e-3), (
        f"max err {jnp.max(jnp.abs(out0 - ref0))}")

    print("KERNEL_OK")
</pallas_src>

<mosaic_0001>
module attributes {stable_mosaic.version = 11 : i64} {
  func.func @_matmul_bias_kernel(%arg0: i32, %arg1: i32, %arg2: i32, %arg3: memref<128x32xf32, #tpu.memory_space<vmem>>, %arg4: memref<32x96xf32, #tpu.memory_space<vmem>>, %arg5: memref<1x96xf32, #tpu.memory_space<vmem>>, %arg6: memref<128x96xf32, #tpu.memory_space<vmem>>, %arg7: memref<128x96xf32, #tpu.memory_space<vmem>>) attributes {dimension_semantics = [#tpu.dimension_semantics<parallel>, #tpu.dimension_semantics<parallel>, #tpu.dimension_semantics<arbitrary>], iteration_bounds = array<i64: 1, 1, 1>, scalar_prefetch = 0 : i64, scratch_operands = 1 : i64, tpu.core_type = #tpu.core_type<tc>, window_params = [{transform_indices = @transform_0, window_bounds = array<i64: 128, 32>}, {transform_indices = @transform_1, window_bounds = array<i64: 32, 96>}, {transform_indices = @transform_2, window_bounds = array<i64: 1, 96>}, {transform_indices = @transform_3, window_bounds = array<i64: 128, 96>}]} {
    %c0_i32 = arith.constant 0 : i32
    %0 = arith.cmpi eq, %arg2, %c0_i32 : i32
    %1 = arith.extui %0 : i1 to i32
    %c0_i32_0 = arith.constant 0 : i32
    %2 = arith.cmpi ne, %1, %c0_i32_0 : i32
    scf.if %2 {
      %cst_10 = arith.constant 0.000000e+00 : f32
      %12 = vector.broadcast %cst_10 : f32 to vector<128x96xf32>
      %c0_11 = arith.constant 0 : index
      %c0_12 = arith.constant 0 : index
      %13 = vector.load %arg7[%c0_11, %c0_12] : memref<128x96xf32, #tpu.memory_space<vmem>>, vector<128x96xf32>
      tpu.vector_store %arg7[%c0_11, %c0_12], %12 {strides = array<i32>} : memref<128x96xf32, #tpu.memory_space<vmem>>, vector<128x96xf32>,
    } else {
    }
    %c0 = arith.constant 0 : index
    %c0_1 = arith.constant 0 : index
    %3 = vector.load %arg7[%c0, %c0_1] : memref<128x96xf32, #tpu.memory_space<vmem>>, vector<128x96xf32>
    %c0_2 = arith.constant 0 : index
    %c0_3 = arith.constant 0 : index
    %4 = vector.load %arg3[%c0_2, %c0_3] : memref<128x32xf32, #tpu.memory_space<vmem>>, vector<128x32xf32>
    %c0_4 = arith.constant 0 : index
    %c0_5 = arith.constant 0 : index
    %5 = vector.load %arg4[%c0_4, %c0_5] : memref<32x96xf32, #tpu.memory_space<vmem>>, vector<32x96xf32>
    %cst = arith.constant dense<0.000000e+00> : vector<128x96xf32>
    %6 = tpu.matmul %4, %5, %cst {dimension_numbers = #tpu.dot_dimension_numbers<[1], [0], [0], [1], [0, 0, 1, 1], [], []>} : vector<128x32xf32>, vector<32x96xf32>, vector<128x96xf32> -> vector<128x96xf32>
    %7 = arith.addf %3, %6 : vector<128x96xf32>
    %c0_6 = arith.constant 0 : index
    %c0_7 = arith.constant 0 : index
    %8 = vector.load %arg7[%c0_6, %c0_7] : memref<128x96xf32, #tpu.memory_space<vmem>>, vector<128x96xf32>
    tpu.vector_store %arg7[%c0_6, %c0_7], %7 {strides = array<i32>} : memref<128x96xf32, #tpu.memory_space<vmem>>, vector<128x96xf32>,
    %c0_i32_8 = arith.constant 0 : i32
    %9 = arith.cmpi eq, %arg2, %c0_i32_8 : i32
    %10 = arith.extui %9 : i1 to i32
    %c0_i32_9 = arith.constant 0 : i32
    %11 = arith.cmpi ne, %10, %c0_i32_9 : i32
    scf.if %11 {
      %c0_10 = arith.constant 0 : index
      %c0_11 = arith.constant 0 : index
      %12 = vector.load %arg7[%c0_10, %c0_11] : memref<128x96xf32, #tpu.memory_space<vmem>>, vector<128x96xf32>
      %c0_12 = arith.constant 0 : index
      %c0_13 = arith.constant 0 : index
      %13 = vector.load %arg5[%c0_12, %c0_13] : memref<1x96xf32, #tpu.memory_space<vmem>>, vector<1x96xf32>
      %14 = vector.broadcast %13 : vector<1x96xf32> to vector<128x96xf32>
      %15 = arith.addf %12, %14 : vector<128x96xf32>
      %c0_14 = arith.constant 0 : index
      %c0_15 = arith.constant 0 : index
      %16 = vector.load %arg6[%c0_14, %c0_15] : memref<128x96xf32, #tpu.memory_space<vmem>>, vector<128x96xf32>
      tpu.vector_store %arg6[%c0_14, %c0_15], %15 {strides = array<i32>} : memref<128x96xf32, #tpu.memory_space<vmem>>, vector<128x96xf32>,
    } else {
    }
    return
  }
  func.func @transform_0(%arg0: i32, %arg1: i32, %arg2: i32) -> (i32, i32) {
    %c0_i32 = arith.constant 0 : i32
    return %arg0, %arg2 : i32, i32
  }
  func.func @transform_1(%arg0: i32, %arg1: i32, %arg2: i32) -> (i32, i32) {
    %c0_i32 = arith.constant 0 : i32
    return %arg2, %arg1 : i32, i32
  }
  func.func @transform_2(%arg0: i32, %arg1: i32, %arg2: i32) -> (i32, i32) {
    %c0_i32 = arith.constant 0 : i32
    %c0_i32_0 = arith.constant 0 : i32
    return %c0_i32, %arg1 : i32, i32
  }
  func.func @transform_3(%arg0: i32, %arg1: i32, %arg2: i32) -> (i32, i32) {
    %c0_i32 = arith.constant 0 : i32
    return %arg0, %arg1 : i32, i32
  }
}

</mosaic_0001>

<bundles_post_ra>
// kernel: tpu_custom_call.1
= control target key start
LH: loop header
LB: loop body
LE: loop exit
PB: predicated region body
PF: predicated region fallthrough
CT: control target
= control target key end

     0   :  { %vm18_vm0 = vcmask 785408   ;;  %v438_v2 = vmov 0.0   ;;  %vm71_vm1 = vcmask 261120   ;;  %s652_s1 = inlined_call_operand.vmem [shape: f32[32,96], index: 1, kind: input, shape index: {}]   ;;  %s653_s0 = inlined_call_operand.vmem [shape: f32[128,32], index: 0, kind: input, shape index: {}]   ;;  %s654_s2 = inlined_call_operand.vmem [shape: f32[1,96], index: 2, kind: input, shape index: {}]   ;;  %s655_s3 = inlined_call_operand.vmem [shape: f32[128,96], index: 3, kind: output, shape index: {}]  }
   0x1   :  { %v70_v0 = vld [vmem:[%s652_s1 + $0x18] sm:$0xff]  ;;  %v69_v1 = vld [vmem:[%s652_s1 + $0x10] sm:$0xff]  ;;  %20 = vst.msk [vmem:[#allocation2 + $0x8] sm:$0xff] %vm18_vm0, %v438_v2  ;;  %19 = vst.msk [vmem:[#allocation2] sm:$0xff] %vm18_vm0, %v438_v2 }
   0x2   :  { %21 = vst.msk [vmem:[#allocation2 + $0x10] sm:$0xff] %vm18_vm0, %v438_v2  ;;  %22 = vst.msk [vmem:[#allocation2 + $0x18] sm:$0xff] %vm18_vm0, %v438_v2  ;;  %397 = vmatprep.subr.mxu0 %v70_v0  ;;  %429 = vmatprep.subr.mxu1 %v70_v0  ;;  %v68_v3 = vld [vmem:[%s652_s1 + $0x8] sm:$0xff]  ;;  %v67_v4 = vld [vmem:[%s652_s1] sm:$0xff] }
   0x3   :  { %23 = vst.msk [vmem:[#allocation2 + $0x20] sm:$0xff] %vm18_vm0, %v438_v2  ;;  %24 = vst.msk [vmem:[#allocation2 + $0x28] sm:$0xff] %vm18_vm0, %v438_v2  ;;  %398 = vmatpush3.msra.mxu0 %v70_v0  ;;  %433 = vmatpush3.msra.mxu1 %v70_v0  ;;  %v51_v5 = vld [vmem:[%s653_s0] sm:$0xff]  ;;  %v52_v7 = vld [vmem:[%s653_s0 + $0x8] sm:$0xff] }
   0x4   :  { %25 = vst.msk [vmem:[#allocation2 + $0x30] sm:$0xff] %vm18_vm0, %v438_v2  ;;  %26 = vst.msk [vmem:[#allocation2 + $0x38] sm:$0xff] %vm18_vm0, %v438_v2  ;;  %399 = vmatprep.subr.mxu0 %v69_v1  ;;  %430 = vmatprep.subr.mxu1 %v69_v1  ;;  %v59_v6 = vld [vmem:[%s653_s0 + $0x40] sm:$0xff]  ;;  %v60_v8 = vld [vmem:[%s653_s0 + $0x48] sm:$0xff] }
   0x5   :  { %27 = vst.msk [vmem:[#allocation2 + $0x40] sm:$0xff] %vm18_vm0, %v438_v2  ;;  %28 = vst.msk [vmem:[#allocation2 + $0x48] sm:$0xff] %vm18_vm0, %v438_v2  ;;  %400 = vmatpush3.msra.mxu0 %v69_v1  ;;  %434 = vmatpush3.msra.mxu1 %v69_v1  ;;  %v53_v9 = vld [vmem:[%s653_s0 + $0x10] sm:$0xff]  ;;  %v54_v11 = vld [vmem:[%s653_s0 + $0x18] sm:$0xff] }
   0x6   :  { %29 = vst.msk [vmem:[#allocation2 + $0x50] sm:$0xff] %vm18_vm0, %v438_v2  ;;  %30 = vst.msk [vmem:[#allocation2 + $0x58] sm:$0xff] %vm18_vm0, %v438_v2  ;;  %401 = vmatprep.subr.mxu0 %v68_v3  ;;  %431 = vmatprep.subr.mxu1 %v68_v3  ;;  %v61_v10 = vld [vmem:[%s653_s0 + $0x50] sm:$0xff]  ;;  %v62_v12 = vld [vmem:[%s653_s0 + $0x58] sm:$0xff] }
   0x7   :  { %31 = vst.msk [vmem:[#allocation2 + $0x60] sm:$0xff] %vm18_vm0, %v438_v2  ;;  %32 = vst.msk [vmem:[#allocation2 + $0x68] sm:$0xff] %vm18_vm0, %v438_v2  ;;  %402 = vmatpush3.msra.mxu0 %v68_v3  ;;  %435 = vmatpush3.msra.mxu1 %v68_v3  ;;  %v55_v13 = vld [vmem:[%s653_s0 + $0x20] sm:$0xff]  ;;  %v56_v15 = vld [vmem:[%s653_s0 + $0x28] sm:$0xff] }
   0x8   :  { %33 = vst.msk [vmem:[#allocation2 + $0x70] sm:$0xff] %vm18_vm0, %v438_v2  ;;  %34 = vst.msk [vmem:[#allocation2 + $0x78] sm:$0xff] %vm18_vm0, %v438_v2  ;;  %403 = vmatprep.subr.mxu0 %v67_v4  ;;  %432 = vmatprep.subr.mxu1 %v67_v4  ;;  %v63_v14 = vld [vmem:[%s653_s0 + $0x60] sm:$0xff]  ;;  %v64_v16 = vld [vmem:[%s653_s0 + $0x68] sm:$0xff] }
   0x9   :  { %404 = vmatpush3.msra.mxu0 %v67_v4  ;;  %436 = vmatpush3.msra.mxu1 %v67_v4  ;;  %v57_v17 = vld [vmem:[%s653_s0 + $0x30] sm:$0xff]  ;;  %v58_v19 = vld [vmem:[%s653_s0 + $0x38] sm:$0xff]  ;;  %v36_v21 = vld [vmem:[#allocation2 + $0x8] sm:$0xff] }
   0xa   :  { %405 = vmatprep.mubr.msk.f32.mxu0 %vm71_vm1, %v51_v5  ;;  %417 = vmatprep.mubr.msk.f32.mxu1 %vm71_vm1, %v59_v6  ;;  %v65_v18 = vld [vmem:[%s653_s0 + $0x70] sm:$0xff]  ;;  %v66_v20 = vld [vmem:[%s653_s0 + $0x78] sm:$0xff]  ;;  %v35_v25 = vld [vmem:[#allocation2] sm:$0xff] }
   0xb   :  { %406 = vmatmul.mubr.msk.f32.vlgmr.msra.gmra.mxu0 %vm71_vm1, %v52_v7  ;;  %418 = vmatmul.mubr.msk.f32.vlgmr.msra.gmra.mxu1 %vm71_vm1, %v60_v8  ;;  %v38_v31 = vld [vmem:[#allocation2 + $0x18] sm:$0xff]  ;;  %v37_v37 = vld [vmem:[#allocation2 + $0x10] sm:$0xff]  ;;  %v40_v43 = vld [vmem:[#allocation2 + $0x28] sm:$0xff] }
   0xc   :  { %408 = vmatprep.mubr.msk.f32.mxu0 %vm71_vm1, %v53_v9  ;;  %420 = vmatprep.mubr.msk.f32.mxu1 %vm71_vm1, %v61_v10  ;;  %v44_v22 = vld [vmem:[#allocation2 + $0x48] sm:$0xff]  ;;  %v43_v26 = vld [vmem:[#allocation2 + $0x40] sm:$0xff]  ;;  %v42_v54 = vld [vmem:[#allocation2 + $0x38] sm:$0xff] }
   0xd   :  { %v46_v32 = vld [vmem:[#allocation2 + $0x58] sm:$0xff]  ;;  %v45_v38 = vld [vmem:[#allocation2 + $0x50] sm:$0xff]  ;;  %v560_v47 = vld [vmem:[%s654_s2] ss:$0 sm:$0xff] }
   0xe   :  { %v48_v44 = vld [vmem:[#allocation2 + $0x68] sm:$0xff]  ;;  %v39_v50 = vld [vmem:[#allocation2 + $0x20] sm:$0xff]  ;;  %v41_v0 = vld [vmem:[#allocation2 + $0x30] sm:$0xff] }
   0xf   :  { %409 = vmatmul.mubr.msk.f32.gmra.mxu0 %vm71_vm1, %v54_v11  ;;  %421 = vmatmul.mubr.msk.f32.gmra.mxu1 %vm71_vm1, %v62_v12  ;;  %v47_v51 = vld [vmem:[#allocation2 + $0x60] sm:$0xff]  ;;  %v50_v59 = vld [vmem:[#allocation2 + $0x78] sm:$0xff]  ;;  %v49_v5 = vld [vmem:[#allocation2 + $0x70] sm:$0xff] }
  0x10   :  { %411 = vmatprep.mubr.msk.f32.mxu0 %vm71_vm1, %v55_v13  ;;  %423 = vmatprep.mubr.msk.f32.mxu1 %vm71_vm1, %v63_v14 }
  0x13   :  { %412 = vmatmul.mubr.msk.f32.gmra.mxu0 %vm71_vm1, %v56_v15  ;;  %424 = vmatmul.mubr.msk.f32.gmra.mxu1 %vm71_vm1, %v64_v16 }
  0x14   :  { %414 = vmatprep.mubr.msk.f32.mxu0 %vm71_vm1, %v57_v17  ;;  %426 = vmatprep.mubr.msk.f32.mxu1 %vm71_vm1, %v65_v18 }
  0x17   :  { %415 = vmatmul.mubr.msk.f32.gmra.mxu0 %vm71_vm1, %v58_v19  ;;  %427 = vmatmul.mubr.msk.f32.gmra.mxu1 %vm71_vm1, %v66_v20 }
  0xcb   :  { %v407_v23 = vpop.f32.mrf.mxu0  ;;  %v419_v24 = vpop.f32.mrf.mxu1 }
  0xcc   :  { %v266_v27 = vadd.f32 %v407_v23, %v36_v21  ;;  %v274_v28 = vadd.f32 %v419_v24, %v44_v22 }
  0xcd   :  { %v186_v29 = vpop.f32.mrf.mxu0  ;;  %v226_v30 = vpop.f32.mrf.mxu1 }
  0xce   :  { %283 = vst.msk [vmem:[#allocation2 + $0x8] sm:$0xff] %vm18_vm0, %v266_v27  ;;  %291 = vst.msk [vmem:[#allocation2 + $0x48] sm:$0xff] %vm18_vm0, %v274_v28  ;;  %v265_v33 = vadd.f32 %v186_v29, %v35_v25  ;;  %v273_v34 = vadd.f32 %v226_v30, %v43_v26 }
  0xcf   :  { %v410_v35 = vpop.f32.mrf.mxu0  ;;  %v422_v36 = vpop.f32.mrf.mxu1 }
  0xd0   :  { %282 = vst.msk [vmem:[#allocation2] sm:$0xff] %vm18_vm0, %v265_v33  ;;  %290 = vst.msk [vmem:[#allocation2 + $0x40] sm:$0xff] %vm18_vm0, %v273_v34  ;;  %v268_v39 = vadd.f32 %v410_v35, %v38_v31  ;;  %v276_v40 = vadd.f32 %v422_v36, %v46_v32 }
  0xd1   :  { %v196_v41 = vpop.f32.mrf.mxu0  ;;  %v236_v42 = vpop.f32.mrf.mxu1 }
  0xd2   :  { %285 = vst.msk [vmem:[#allocation2 + $0x18] sm:$0xff] %vm18_vm0, %v268_v39  ;;  %293 = vst.msk [vmem:[#allocation2 + $0x58] sm:$0xff] %vm18_vm0, %v276_v40  ;;  %v267_v45 = vadd.f32 %v196_v41, %v37_v37  ;;  %v275_v46 = vadd.f32 %v236_v42, %v45_v38 }
  0xd3   :  { %v413_v48 = vpop.f32.mrf.mxu0  ;;  %v425_v49 = vpop.f32.mrf.mxu1 }
  0xd4   :  { %284 = vst.msk [vmem:[#allocation2 + $0x10] sm:$0xff] %vm18_vm0, %v267_v45  ;;  %292 = vst.msk [vmem:[#allocation2 + $0x50] sm:$0xff] %vm18_vm0, %v275_v46  ;;  %v270_v52 = vadd.f32 %v413_v48, %v40_v43  ;;  %v278_v53 = vadd.f32 %v425_v49, %v48_v44 }
  0xd5   :  { %v302_v55 = vld [vmem:[#allocation2 + $0x8] sm:$0xff]  ;;  %v206_v57 = vpop.f32.mrf.mxu0  ;;  %v246_v58 = vpop.f32.mrf.mxu1 }
  0xd6   :  { %v310_v56 = vld [vmem:[#allocation2 + $0x48] sm:$0xff]  ;;  %v325_v60 = vadd.f32 %v560_v47, %v302_v55  ;;  %287 = vst.msk [vmem:[#allocation2 + $0x28] sm:$0xff] %vm18_vm0, %v270_v52  ;;  %295 = vst.msk [vmem:[#allocation2 + $0x68] sm:$0xff] %vm18_vm0, %v278_v53  ;;  %v269_v62 = vadd.f32 %v206_v57, %v39_v50  ;;  %v277_v63 = vadd.f32 %v246_v58, %v47_v51 }
  0xd7   :  { %v333_v61 = vadd.f32 %v560_v47, %v310_v56  ;;  %v301_v1 = vld [vmem:[#allocation2] sm:$0xff]  ;;  %v416_v3 = vpop.f32.mrf.mxu0  ;;  %v428_v4 = vpop.f32.mrf.mxu1 }
  0xd8   :  { %v309_v2 = vld [vmem:[#allocation2 + $0x40] sm:$0xff]  ;;  %341 = vst.msk [vmem:[%s655_s3 + $0x8] sm:$0xff] %vm18_vm0, %v325_v60  ;;  %v324_v6 = vadd.f32 %v560_v47, %v301_v1  ;;  %286 = vst.msk [vmem:[#allocation2 + $0x20] sm:$0xff] %vm18_vm0, %v269_v62  ;;  %v272_v8 = vadd.f32 %v416_v3, %v42_v54  ;;  %v280_v9 = vadd.f32 %v428_v4, %v50_v59 }
  0xd9   :  { %349 = vst.msk [vmem:[%s655_s3 + $0x48] sm:$0xff] %vm18_vm0, %v333_v61  ;;  %v332_v7 = vadd.f32 %v560_v47, %v309_v2  ;;  %294 = vst.msk [vmem:[#allocation2 + $0x60] sm:$0xff] %vm18_vm0, %v277_v63  ;;  %v304_v10 = vld [vmem:[#allocation2 + $0x18] sm:$0xff]  ;;  %v216_v12 = vpop.f32.mrf.mxu0  ;;  %v256_v13 = vpop.f32.mrf.mxu1 }
  0xda   :  { %v312_v11 = vld [vmem:[#allocation2 + $0x58] sm:$0xff]  ;;  %340 = vst.msk [vmem:[%s655_s3] sm:$0xff] %vm18_vm0, %v324_v6  ;;  %v327_v14 = vadd.f32 %v560_v47, %v304_v10  ;;  %289 = vst.msk [vmem:[#allocation2 + $0x38] sm:$0xff] %vm18_vm0, %v272_v8  ;;  %v271_v16 = vadd.f32 %v216_v12, %v41_v0  ;;  %v279_v17 = vadd.f32 %v256_v13, %v49_v5 }
  0xdb   :  { %348 = vst.msk [vmem:[%s655_s3 + $0x40] sm:$0xff] %vm18_vm0, %v332_v7  ;;  %v335_v15 = vadd.f32 %v560_v47, %v312_v11  ;;  %297 = vst.msk [vmem:[#allocation2 + $0x78] sm:$0xff] %vm18_vm0, %v280_v9  ;;  %v303_v18 = vld [vmem:[#allocation2 + $0x10] sm:$0xff] }
  0xdc   :  { %v311_v19 = vld [vmem:[#allocation2 + $0x50] sm:$0xff]  ;;  %343 = vst.msk [vmem:[%s655_s3 + $0x18] sm:$0xff] %vm18_vm0, %v327_v14  ;;  %v326_v20 = vadd.f32 %v560_v47, %v303_v18  ;;  %288 = vst.msk [vmem:[#allocation2 + $0x30] sm:$0xff] %vm18_vm0, %v271_v16 }
  0xdd   :  { %351 = vst.msk [vmem:[%s655_s3 + $0x58] sm:$0xff] %vm18_vm0, %v335_v15  ;;  %v334_v21 = vadd.f32 %v560_v47, %v311_v19  ;;  %296 = vst.msk [vmem:[#allocation2 + $0x70] sm:$0xff] %vm18_vm0, %v279_v17  ;;  %v306_v22 = vld [vmem:[#allocation2 + $0x28] sm:$0xff] }
  0xde   :  { %v314_v23 = vld [vmem:[#allocation2 + $0x68] sm:$0xff]  ;;  %342 = vst.msk [vmem:[%s655_s3 + $0x10] sm:$0xff] %vm18_vm0, %v326_v20  ;;  %v329_v24 = vadd.f32 %v560_v47, %v306_v22 }
  0xdf   :  { %350 = vst.msk [vmem:[%s655_s3 + $0x50] sm:$0xff] %vm18_vm0, %v334_v21  ;;  %v337_v25 = vadd.f32 %v560_v47, %v314_v23  ;;  %v305_v26 = vld [vmem:[#allocation2 + $0x20] sm:$0xff] }
  0xe0   :  { %v313_v27 = vld [vmem:[#allocation2 + $0x60] sm:$0xff]  ;;  %345 = vst.msk [vmem:[%s655_s3 + $0x28] sm:$0xff] %vm18_vm0, %v329_v24  ;;  %v328_v28 = vadd.f32 %v560_v47, %v305_v26 }
  0xe1   :  { %353 = vst.msk [vmem:[%s655_s3 + $0x68] sm:$0xff] %vm18_vm0, %v337_v25  ;;  %v336_v29 = vadd.f32 %v560_v47, %v313_v27  ;;  %v308_v30 = vld [vmem:[#allocation2 + $0x38] sm:$0xff] }
  0xe2   :  { %v316_v31 = vld [vmem:[#allocation2 + $0x78] sm:$0xff]  ;;  %344 = vst.msk [vmem:[%s655_s3 + $0x20] sm:$0xff] %vm18_vm0, %v328_v28  ;;  %v331_v32 = vadd.f32 %v560_v47, %v308_v30 }
  0xe3   :  { %352 = vst.msk [vmem:[%s655_s3 + $0x60] sm:$0xff] %vm18_vm0, %v336_v29  ;;  %v339_v33 = vadd.f32 %v560_v47, %v316_v31  ;;  %v307_v34 = vld [vmem:[#allocation2 + $0x30] sm:$0xff] }
  0xe4   :  { %v315_v35 = vld [vmem:[#allocation2 + $0x70] sm:$0xff]  ;;  %347 = vst.msk [vmem:[%s655_s3 + $0x38] sm:$0xff] %vm18_vm0, %v331_v32  ;;  %v330_v36 = vadd.f32 %v560_v47, %v307_v34 }
  0xe5   :  { %355 = vst.msk [vmem:[%s655_s3 + $0x78] sm:$0xff] %vm18_vm0, %v339_v33  ;;  %v338_v37 = vadd.f32 %v560_v47, %v315_v35 }
  0xe6   :  { %346 = vst.msk [vmem:[%s655_s3 + $0x30] sm:$0xff] %vm18_vm0, %v330_v36 }
  0xe7   :  { %354 = vst.msk [vmem:[%s655_s3 + $0x70] sm:$0xff] %vm18_vm0, %v338_v37 }

</bundles_post_ra>
